<compile_context>
chip_gen: v5e
topology: v5e:2x2
jax: 0.10.0
libtpu: 0.0.40
codegen_flags: <defaults>
</compile_context>

<pallas_src>
import functools

import jax
import jax.numpy as jnp
from jax.experimental import pallas as pl
from jax.experimental.pallas import tpu as pltpu


def _hloss_kernel(x_ref, o_ref, *, batch, tile_b, tiles_per_core):
    c = pl.program_id(0)          # core (parallel) axis
    t = pl.program_id(1)          # tile (arbitrary / reduction) axis
    g = c * tiles_per_core + t    # global tile index

    @pl.when(t == 0)
    def _():
        o_ref[...] = jnp.zeros_like(o_ref)

    x = x_ref[...].astype(jnp.float32)                      # (TB, C)

    m = jnp.max(x, axis=1, keepdims=True)                   # (TB, 1)
    shifted = x - m                                          # (TB, C)
    ex = jnp.exp(shifted)                                    # (TB, C)  (EUP)
    denom = jnp.sum(ex, axis=1, keepdims=True)               # (TB, 1)
    num = jnp.sum(ex * shifted, axis=1, keepdims=True)       # (TB, 1)
    # per-row entropy: -sum p*logp == log(denom) - sum(ex*shifted)/denom
    ent = jnp.log(denom) - num / denom                       # (TB, 1) narrow ops

    # Narrow validity mask.  Padded rows of a partial last tile and overhang
    # (clamped) tiles may hold garbage / NaN; everything above is per-row and
    # this select stops any propagation.  Keep this mask before ANY cross-row
    # reduction.
    row = g * tile_b + jax.lax.broadcasted_iota(jnp.int32, (tile_b, 1), 0)
    ent = jnp.where(row < batch, ent, 0.0)

    tile_sum = jnp.sum(ent)                                  # scalar f32

    # Accumulate the raw entropy sum into element [0,0] of this core's
    # VMEM-resident (8,128) accumulator block (adding exact 0.0 elsewhere).
    r = jax.lax.broadcasted_iota(jnp.int32, o_ref.shape, 0)
    l = jax.lax.broadcasted_iota(jnp.int32, o_ref.shape, 1)
    o_ref[...] += jnp.where((r == 0) & (l == 0), tile_sum, 0.0)


def hloss(x, *, max_tile_rows=None):
    """Mean over batch of -sum_c softmax(x)*log_softmax(x); x is (B, C)."""
    B, C = x.shape
    itemsize = jnp.dtype(x.dtype).itemsize

    # Sublane granularity for the input dtype (sub-32-bit dtypes pack rows).
    gran = 8 if itemsize >= 4 else (16 if itemsize == 2 else 32)

    # Per-chip VMEM budget: v5e/v6e have 128 MiB physical, v7x has 64 MiB.
    try:
        vmem_cap = pltpu.get_tpu_info().vmem_capacity_bytes
    except Exception:
        vmem_cap = 64 * 1024 * 1024                      # conservative default
    if vmem_cap >= 100 * 1024 * 1024:                    # v5e / v6e
        vmem_limit = 96 * 1024 * 1024
    else:                                                # v7x
        vmem_limit = 48 * 1024 * 1024
    budget = (vmem_limit * 3) // 4                       # headroom

    # Live VMEM per tile row: 2x double-buffered input (input dtype) plus
    # ~4 block-sized f32 intermediates (x upcast / shifted / ex / ex*shifted).
    per_row = 2 * C * itemsize + 4 * C * 4
    cap_rows = max(gran, (budget // per_row) // gran * gran)

    if B <= gran:
        tb = B                                           # full-extent block
    else:
        tb = min(cap_rows, (B // gran) * gran)
        if max_tile_rows is not None:
            tb = min(tb, max_tile_rows)
        tb = max(gran, (tb // gran) * gran)
    num_tiles = pl.cdiv(B, tb)

    # Megacore split (2 TCs on v7x; just a short serial loop on v5e/v6e).
    num_cores = 2 if num_tiles >= 2 else 1
    tiles_per_core = pl.cdiv(num_tiles, num_cores)

    def x_map(c, t):
        g = c * tiles_per_core + t
        # Clamp overhang steps of the last core to a valid block; their rows
        # are zeroed by the in-kernel row mask.
        return (jnp.minimum(g, num_tiles - 1), 0)

    cost = pl.CostEstimate(
        flops=4 * B * C,
        transcendentals=B * C,
        bytes_accessed=B * C * itemsize + num_cores * 8 * 128 * 4,
    )

    out = pl.pallas_call(
        functools.partial(_hloss_kernel, batch=B, tile_b=tb,
                          tiles_per_core=tiles_per_core),
        out_shape=jax.ShapeDtypeStruct((num_cores * 8, 128), jnp.float32),
        grid_spec=pltpu.PrefetchScalarGridSpec(
            num_scalar_prefetch=0,
            grid=(num_cores, tiles_per_core),
            in_specs=[pl.BlockSpec((tb, C), x_map)],
            out_specs=pl.BlockSpec((8, 128), lambda c, t: (c, 0)),
        ),
        compiler_params=pltpu.CompilerParams(
            dimension_semantics=("parallel", "arbitrary"),
            vmem_limit_bytes=vmem_limit,
        ),
        cost_estimate=cost,
    )(x)

    # Per-core partial sums live at out[8*c, 0]; everything else is exact 0.0,
    # so a plain sum recovers the total entropy.  Divide by the true B once.
    return jnp.sum(out) / B


def hloss_ref(x):
    # pure-JAX reference for sanity checking
    xf = x.astype(jnp.float32)
    logp = jax.nn.log_softmax(xf, axis=1)
    p = jax.nn.softmax(xf, axis=1)
    return jnp.mean(-jnp.sum(p * logp, axis=1))


if __name__ == "__main__":
    key = jax.random.PRNGKey(0)
    k1, k2, k3 = jax.random.split(key, 3)

    # Primary small case: (batch, classes) = (8, 128), single tile, one core.
    x1 = jax.random.normal(k1, (8, 128), dtype=jnp.float32)
    out1 = hloss(x1)
    jax.block_until_ready(out1)
    ref1 = hloss_ref(x1)
    assert jnp.allclose(out1, ref1, atol=1e-5, rtol=1e-5), (out1, ref1)

    # Ragged batch with forced small tiles: 5 tiles -> 2 cores, 3 tiles/core,
    # one overhang (clamped+masked) step, partial last tile, final divide by B.
    x2 = jax.random.normal(k2, (100, 384), dtype=jnp.float32)
    out2 = hloss(x2, max_tile_rows=24)
    jax.block_until_ready(out2)
    ref2 = hloss_ref(x2)
    assert jnp.allclose(out2, ref2, atol=1e-5, rtol=1e-5), (out2, ref2)

    # bf16 logits (halved HBM traffic); kernel accumulates in f32.
    x3 = jax.random.normal(k3, (64, 256), dtype=jnp.float32).astype(jnp.bfloat16)
    out3 = hloss(x3)
    jax.block_until_ready(out3)
    ref3 = hloss_ref(x3)
    assert jnp.allclose(out3, ref3, atol=1e-4, rtol=1e-4), (out3, ref3)

    print("KERNEL_OK")
</pallas_src>

<mosaic_0001>
module attributes {stable_mosaic.version = 11 : i64} {
  func.func @_hloss_kernel(%arg0: i32, %arg1: i32, %arg2: memref<8x128xf32, #tpu.memory_space<vmem>>, %arg3: memref<8x128xf32, #tpu.memory_space<vmem>>) attributes {dimension_semantics = [#tpu.dimension_semantics<parallel>, #tpu.dimension_semantics<arbitrary>], iteration_bounds = array<i64: 1, 1>, scalar_prefetch = 0 : i64, scratch_operands = 0 : i64, tpu.core_type = #tpu.core_type<tc>, window_params = [{transform_indices = @transform_0, window_bounds = array<i64: 8, 128>}, {transform_indices = @transform_1, window_bounds = array<i64: 8, 128>}]} {
    %c1_i32 = arith.constant 1 : i32
    %0 = arith.muli %arg0, %c1_i32 : i32
    %1 = arith.addi %0, %arg1 : i32
    %c0_i32 = arith.constant 0 : i32
    %2 = arith.cmpi eq, %arg1, %c0_i32 : i32
    %3 = arith.extui %2 : i1 to i32
    %c0_i32_0 = arith.constant 0 : i32
    %4 = arith.cmpi ne, %3, %c0_i32_0 : i32
    scf.if %4 {
      %cst_14 = arith.constant 0.000000e+00 : f32
      %44 = vector.broadcast %cst_14 : f32 to vector<8x128xf32>
      %c0_15 = arith.constant 0 : index
      %c0_16 = arith.constant 0 : index
      %45 = vector.load %arg3[%c0_15, %c0_16] : memref<8x128xf32, #tpu.memory_space<vmem>>, vector<8x128xf32>
      tpu.vector_store %arg3[%c0_15, %c0_16], %44 {strides = array<i32>} : memref<8x128xf32, #tpu.memory_space<vmem>>, vector<8x128xf32>,
    } else {
    }
    %c0 = arith.constant 0 : index
    %c0_1 = arith.constant 0 : index
    %5 = vector.load %arg2[%c0, %c0_1] : memref<8x128xf32, #tpu.memory_space<vmem>>, vector<8x128xf32>
    %cst = arith.constant dense<0xFF800000> : vector<8xf32>
    %6 = vector.multi_reduction <maximumf>, %5, %cst [1] : vector<8x128xf32> to vector<8xf32>
    %7 = vector.shape_cast %6 : vector<8xf32> to vector<8x1xf32>
    %8 = vector.broadcast %7 : vector<8x1xf32> to vector<8x128xf32>
    %9 = arith.subf %5, %8 : vector<8x128xf32>
    %10 = math.exp %9 : vector<8x128xf32>
    %cst_2 = arith.constant dense<0.000000e+00> : vector<8xf32>
    %11 = vector.multi_reduction <add>, %10, %cst_2 [1] : vector<8x128xf32> to vector<8xf32>
    %12 = vector.shape_cast %11 : vector<8xf32> to vector<8x1xf32>
    %13 = arith.mulf %10, %9 : vector<8x128xf32>
    %cst_3 = arith.constant dense<0.000000e+00> : vector<8xf32>
    %14 = vector.multi_reduction <add>, %13, %cst_3 [1] : vector<8x128xf32> to vector<8xf32>
    %15 = vector.shape_cast %14 : vector<8xf32> to vector<8x1xf32>
    %16 = math.log %12 : vector<8x1xf32>
    %17 = arith.divf %15, %12 : vector<8x1xf32>
    %18 = arith.subf %16, %17 : vector<8x1xf32>
    %c8_i32 = arith.constant 8 : i32
    %19 = arith.muli %1, %c8_i32 : i32
    %20 = tpu.iota {dimensions = array<i32: 0>} : vector<8x1xi32>
    %21 = vector.broadcast %19 : i32 to vector<8x1xi32>
    %22 = arith.addi %21, %20 : vector<8x1xi32>
    %c8_i32_4 = arith.constant 8 : i32
    %23 = vector.broadcast %c8_i32_4 : i32 to vector<8x1xi32>
    %24 = arith.cmpi slt, %22, %23 : vector<8x1xi32>
    %cst_5 = arith.constant 0.000000e+00 : f32
    %25 = vector.broadcast %cst_5 : f32 to vector<8x1xf32>
    %26 = arith.select %24, %18, %25 : vector<8x1xi1>, vector<8x1xf32>
    %27 = vector.shape_cast %26 : vector<8x1xf32> to vector<1x8x1xf32>
    %cst_6 = arith.constant dense<0.000000e+00> : vector<1xf32>
    %28 = vector.multi_reduction <add>, %27, %cst_6 [1, 2] : vector<1x8x1xf32> to vector<1xf32>
    %29 = vector.shape_cast %28 : vector<1xf32> to vector<1x1x1xf32>
    %30 = vector.extract %29[0, 0, 0] : f32 from vector<1x1x1xf32>
    %31 = tpu.iota {dimensions = array<i32: 0>} : vector<8x128xi32>
    %32 = tpu.iota {dimensions = array<i32: 1>} : vector<8x128xi32>
    %c0_7 = arith.constant 0 : index
    %c0_8 = arith.constant 0 : index
    %33 = vector.load %arg3[%c0_7, %c0_8] : memref<8x128xf32, #tpu.memory_space<vmem>>, vector<8x128xf32>
    %c0_i32_9 = arith.constant 0 : i32
    %34 = vector.broadcast %c0_i32_9 : i32 to vector<8x128xi32>
    %35 = arith.cmpi eq, %31, %34 : vector<8x128xi32>
    %c0_i32_10 = arith.constant 0 : i32
    %36 = vector.broadcast %c0_i32_10 : i32 to vector<8x128xi32>
    %37 = arith.cmpi eq, %32, %36 : vector<8x128xi32>
    %38 = arith.andi %35, %37 : vector<8x128xi1>
    %cst_11 = arith.constant 0.000000e+00 : f32
    %39 = vector.broadcast %30 : f32 to vector<8x128xf32>
    %40 = vector.broadcast %cst_11 : f32 to vector<8x128xf32>
    %41 = arith.select %38, %39, %40 : vector<8x128xi1>, vector<8x128xf32>
    %42 = arith.addf %33, %41 : vector<8x128xf32>
    %c0_12 = arith.constant 0 : index
    %c0_13 = arith.constant 0 : index
    %43 = vector.load %arg3[%c0_12, %c0_13] : memref<8x128xf32, #tpu.memory_space<vmem>>, vector<8x128xf32>
    tpu.vector_store %arg3[%c0_12, %c0_13], %42 {strides = array<i32>} : memref<8x128xf32, #tpu.memory_space<vmem>>, vector<8x128xf32>,
    return
  }
  func.func @transform_0(%arg0: i32, %arg1: i32) -> (i32, i32) {
    %c1_i32 = arith.constant 1 : i32
    %0 = arith.muli %arg0, %c1_i32 : i32
    %1 = arith.addi %0, %arg1 : i32
    %c0_i32 = arith.constant 0 : i32
    %2 = arith.minsi %1, %c0_i32 : i32
    %c0_i32_0 = arith.constant 0 : i32
    %c0_i32_1 = arith.constant 0 : i32
    return %2, %c0_i32_0 : i32, i32
  }
  func.func @transform_1(%arg0: i32, %arg1: i32) -> (i32, i32) {
    %c0_i32 = arith.constant 0 : i32
    %c0_i32_0 = arith.constant 0 : i32
    return %arg0, %c0_i32 : i32, i32
  }
}

</mosaic_0001>

<bundles_post_ra>
// kernel: tpu_custom_call.1
= control target key start
LH: loop header
LB: loop body
LE: loop exit
PB: predicated region body
PF: predicated region fallthrough
CT: control target
= control target key end

     0   :  { %6 = vsyncpa [#allocation3], 0  ;;  %s194_s0 = inlined_call_operand.hbm [shape: f32[8,128], index: 0, kind: input, shape index: {}]   ;;  %s195_s1 = inlined_call_operand.hbm [shape: f32[8,128], index: 1, kind: output, shape index: {}]  }
   0x1   :  { %7 = vsyncpa [#allocation4], 0  ;;  %s18_s8 = sshll.u32 %s194_s0, 4  ;;  %s176_s9 = smov [#allocation2]   ;;  %s19_s8 = int_to_ptr.hbm [resolvable:$true] %s18_s8 }
   0x2   :  { %s20_s10 = sshll.u32 %s176_s9, 4  ;;  %s21_s10 = int_to_ptr.vmem [resolvable:$true] %s20_s10 }
   0x3   :  { %23 = dma.hbm_to_vmem [thread:$0]  %s19_s8, 128, %s21_s10, [#allocation3]  }
   0x4   :  { %172 = dma.done.wait [#allocation3], 128  }
   0x5   :  { %173 = vsyncadd [#allocation3], 4294967168  ;;  %v37_v0 = vld [vmem:[#allocation2] sm:$0xff]  ;;  %vm73_vm4 = vcmask 7168   ;;  %v67_v30 = vlaneseq  ;;  %s177_s0 = smov [#allocation5]   ;;  %s101_s15 = sshll.u32 %s195_s1, 4  ;;  %s102_s15 = int_to_ptr.hbm [resolvable:$true] %s101_s15 }
   0x6   :  { %38 = vmax.xlane.f32.xlu0 %v37_v0  ;;  %s99_s11 = sshll.u32 %s177_s0, 4  ;;  %s100_s11 = int_to_ptr.vmem [resolvable:$true] %s99_s11 }
   0x7   :  { %v68_v31 = vshrl.u32 %v67_v30, 7  ;;  %v85_v32 = vand.u32 127, %v67_v30 }
   0x9   :  { %vm87_vm5 = vcmp.eq.s32.totalorder %v68_v31, 0  ;;  %vm88_vm6 = vcmp.eq.s32.totalorder %v85_v32, 0 }
   0xa   :  { %vm89_vm7 = vmand %vm87_vm5, %vm88_vm6 }
  0x79   :  { %v39_v1 = vpop.xlane.xlu0 %38 }
  0x7a   :  { %v40_v2 = vsub.f32 %v37_v0, %v39_v1 }
  0x7c   :  { %v41_v3 = vmul.f32 1.442695, %v40_v2 }
  0x7e   :  { %118 = vpow2.f32 %v41_v3 }
  0x84   :  { %v119_v4 = vpop.eup %118 }
  0x85   :  { %43 = vadd.xlane.f32.xlu0 %v119_v4  ;;  %v45_v5 = vmul.f32 %v119_v4, %v40_v2 }
  0x87   :  { %46 = vadd.xlane.f32.xlu1 %v45_v5 }
  0xf8   :  { %v44_v6 = vpop.xlane.xlu0 %43 }
  0xf9   :  { %120 = vrcp.f32 %v44_v6  ;;  %v61_v10 = vand.u32 2147483648, %v44_v6  ;;  %v59_v12 = vand.u32 2147483647, %v44_v6  ;;  %vm55_vm1 = vweird.f32 %v44_v6 }
  0xfa   :  { %122 = vlog2.f32 %v44_v6  ;;  %v47_v18 = vpop.xlane.xlu1 %46 }
  0xfb   :  { %v62_v15 = vor.u32 1.1754944e-38, %v61_v10  ;;  %vm60_vm3 = vcmp.eq.f32.partialorder %v59_v12, 8.507059e+37 }
  0xff   :  { %v121_v7 = vpop.eup %120 }
 0x100   :  { %v51_v8 = vmul.f32 %v121_v7, %v44_v6  ;;  %vm56_vm0 = vweird.f32 %v121_v7  ;;  %v123_v14 = vpop.eup %122 }
 0x101   :  { %vm57_vm2 = vmor %vm55_vm1, %vm56_vm0  ;;  %v49_v20 = vmul.f32 0.6931472, %v123_v14 }
 0x102   :  { %v52_v9 = vsub.f32 1.0, %v51_v8 }
 0x104   :  { %v53_v11 = vmul.f32 %v121_v7, %v52_v9 }
 0x106   :  { %v54_v13 = vadd.f32 %v121_v7, %v53_v11 }
 0x108   :  { %v58_v16 = vsel %vm57_vm2, %v121_v7, %v54_v13 }
 0x109   :  { %v63_v17 = vsel %vm60_vm3, %v62_v15, %v58_v16 }
 0x10a   :  { %v64_v19 = vmul.f32 %v63_v17, %v47_v18 }
 0x10c   :  { %v65_v21 = vsub.f32 %v49_v20, %v64_v19 }
 0x10e   :  { %v74_v22 = vsel %vm73_vm4, %v65_v21, 0.0 }
 0x10f   :  { %75 = vadd.xlane.f32.xlu1 %v74_v22 }
 0x182   :  { %v76_v23 = vpop.xlane.xlu1 %75 }
 0x183   :  { %v77_v24 = vrot.slane %v76_v23, 4 }
 0x185   :  { %v78_v25 = vadd.f32 %v77_v24, %v76_v23 }
 0x187   :  { %v79_v26 = vrot.slane %v78_v25, 2 }
 0x189   :  { %v80_v27 = vadd.f32 %v79_v26, %v78_v25 }
 0x18b   :  { %v81_v28 = vrot.slane %v80_v27, 1 }
 0x18d   :  { %v82_v29 = vadd.f32 %v81_v28, %v80_v27 }
 0x18f   :  { %113 = vpush %v82_v29 }
 0x1c0   :  { %s114_s12 = spop %113 }
 0x1c1   :  { %v90_v33 = vstv %s114_s12 }
 0x1c2   :  { %v91_v34 = vsel %vm89_vm7, %v90_v33, 0.0 }
 0x1c3   :  { %93 = vst [vmem:[#allocation5] sm:$0xff] %v91_v34 }
 0x1c4   :  { %104 = dma.vmem_to_hbm [thread:$0]  %s100_s11, 128, %s102_s15, [#allocation4]  }
 0x1c5   :  { %174 = dma.done.wait [#allocation4], 128  }
 0x1c6   :  { %175 = vsyncadd [#allocation4], 4294967168 }
 0x1c7   :  { %109 = vsyncpa [#allocation3], 1 }
 0x1c8   :  { %110 = vsyncpa [#allocation4], 1 }

</bundles_post_ra>
